<compile_context>
chip_gen: v6e
topology: v6e:2x2x1
jax: 0.10.0
libtpu: 0.0.40
codegen_flags: <defaults>
</compile_context>

<pallas_src>
import jax
import jax.numpy as jnp
import numpy as np
from jax.experimental import pallas as pl
from jax.experimental.pallas import tpu as pltpu


def output_conv_kernel(x_ref, wc_ref, wr_ref, bc_ref, br_ref, oc_ref, or_ref):
    """Fused dual-head 3x3 'same' conv over the whole batch.

    x_ref  : (B, H+2, W+2, Cin)  zero-padded NHWC input (VMEM)
    wc_ref : (9*Cin, Ccls)       classification weights, (ky,kx,ci)-major rows
    wr_ref : (9*Cin, Creg)       regression weights
    bc_ref : (1, Ccls)           classification bias
    br_ref : (1, Creg)           regression bias
    oc_ref : (B*H*W, Ccls)       classification output (row = (b, y, x))
    or_ref : (B*H*W, Creg)       regression output
    """
    B, Hp, Wp, Cin = x_ref.shape
    H, W = Hp - 2, Wp - 2
    M = B * H * W

    xp = x_ref[...]  # (B, H+2, W+2, Cin)

    # im2col: concatenate the 9 shifted windows along the channel (lane) axis,
    # then collapse the leading (B, H, W) dims -- a layout-preserving reshape.
    taps = [xp[:, ky:ky + H, kx:kx + W, :]
            for ky in range(3) for kx in range(3)]          # 9 x (B, H, W, Cin)
    patches = jnp.concatenate(taps, axis=3).reshape(M, 9 * Cin)

    # One MXU matmul per head, f32 accumulation, bias folded in.
    acc_c = jnp.dot(patches, wc_ref[...],
                    preferred_element_type=jnp.float32) + bc_ref[...]
    acc_r = jnp.dot(patches, wr_ref[...],
                    preferred_element_type=jnp.float32) + br_ref[...]

    oc_ref[...] = acc_c.astype(oc_ref.dtype)
    or_ref[...] = acc_r.astype(or_ref.dtype)


def output_forward(x_nchw, w_cls, b_cls, w_reg, b_reg, k):
    """Forward pass of `Output`.

    x_nchw : (B, Cin, H, W)                 float32 (PyTorch NCHW convention)
    w_cls  : (3, 3, Cin, (num_classes+1)*k) HWIO
    b_cls  : ((num_classes+1)*k,)
    w_reg  : (3, 3, Cin, 4*k)               HWIO
    b_reg  : (4*k,)
    Returns [cls_flat, reg_flat] with shapes
      (B, H*W*k, num_classes+1) and (B, H*W*k, 4)  -- same as flatten_conv.
    """
    B, Cin, H, W = x_nchw.shape
    Ccls = w_cls.shape[-1]
    Creg = w_reg.shape[-1]
    M = B * H * W

    # Single fused pre-pass: NCHW -> NHWC + 1px zero halo.
    x_pad = jnp.pad(jnp.transpose(x_nchw, (0, 2, 3, 1)),
                    ((0, 0), (1, 1), (1, 1), (0, 0)))

    # Pre-reshape weights/biases so the kernel is a pure GEMM.
    wc2d = w_cls.reshape(9 * Cin, Ccls)
    wr2d = w_reg.reshape(9 * Cin, Creg)
    bc2d = b_cls.reshape(1, Ccls).astype(jnp.float32)
    br2d = b_reg.reshape(1, Creg).astype(jnp.float32)

    out_cls, out_reg = pl.pallas_call(
        output_conv_kernel,
        grid=(1,),
        out_shape=(jax.ShapeDtypeStruct((M, Ccls), x_nchw.dtype),
                   jax.ShapeDtypeStruct((M, Creg), x_nchw.dtype)),
        in_specs=[
            pl.BlockSpec((B, H + 2, W + 2, Cin), lambda i: (0, 0, 0, 0)),
            pl.BlockSpec((9 * Cin, Ccls), lambda i: (0, 0)),
            pl.BlockSpec((9 * Cin, Creg), lambda i: (0, 0)),
            pl.BlockSpec((1, Ccls), lambda i: (0, 0)),
            pl.BlockSpec((1, Creg), lambda i: (0, 0)),
        ],
        out_specs=(pl.BlockSpec((M, Ccls), lambda i: (0, 0)),
                   pl.BlockSpec((M, Creg), lambda i: (0, 0))),
        compiler_params=pltpu.CompilerParams(
            dimension_semantics=("arbitrary",)),
    )(x_pad, wc2d, wr2d, bc2d, br2d)

    # flatten_conv: the kernel rows are already (b, y, x)-major, so the
    # PyTorch .permute(0,2,3,1).view(bs,-1,nf//k) is a free contiguous reshape.
    cls_flat = out_cls.reshape(B, H * W * k, Ccls // k)
    reg_flat = out_reg.reshape(B, H * W * k, Creg // k)
    return [cls_flat, reg_flat]


if __name__ == "__main__":
    # Module hyperparameters: Output(k, nin, bias, num_classes).
    k = 2
    nin = 4
    num_classes = 3
    bias_val = -4.0  # NOTE: in the reference, bias.data.zero_().add(bias) is NOT
                     # in-place on the parameter (.add returns a new tensor), so
                     # the classification bias ends up as zeros. Reproduced exactly.
    B, H, W = 2, 8, 8
    Ccls = (num_classes + 1) * k
    Creg = 4 * k

    key = jax.random.PRNGKey(0)
    k_x, k_w1, k_w2, k_b2 = jax.random.split(key, 4)
    x = jax.random.normal(k_x, (B, nin, H, W), jnp.float32)
    w_cls = 0.1 * jax.random.normal(k_w1, (3, 3, nin, Ccls), jnp.float32)
    b_cls = jnp.zeros((Ccls,), jnp.float32)  # see bias note above
    w_reg = 0.1 * jax.random.normal(k_w2, (3, 3, nin, Creg), jnp.float32)
    b_reg = 0.1 * jax.random.normal(k_b2, (Creg,), jnp.float32)

    cls_out, reg_out = output_forward(x, w_cls, b_cls, w_reg, b_reg, k)
    jax.block_until_ready((cls_out, reg_out))

    # Pure-JAX reference (lax conv) to validate the kernel.
    x_nhwc = jnp.transpose(x, (0, 2, 3, 1))
    dn = ("NHWC", "HWIO", "NHWC")
    ref_cls = jax.lax.conv_general_dilated(
        x_nhwc, w_cls, (1, 1), "SAME", dimension_numbers=dn) + b_cls
    ref_reg = jax.lax.conv_general_dilated(
        x_nhwc, w_reg, (1, 1), "SAME", dimension_numbers=dn) + b_reg
    ref_cls = ref_cls.reshape(B, H * W * k, Ccls // k)
    ref_reg = ref_reg.reshape(B, H * W * k, Creg // k)

    assert cls_out.shape == (B, H * W * k, num_classes + 1)
    assert reg_out.shape == (B, H * W * k, 4)
    np.testing.assert_allclose(np.asarray(cls_out), np.asarray(ref_cls),
                               rtol=1e-4, atol=1e-4)
    np.testing.assert_allclose(np.asarray(reg_out), np.asarray(ref_reg),
                               rtol=1e-4, atol=1e-4)
    print("KERNEL_OK")
</pallas_src>

<mosaic_0001>
module attributes {stable_mosaic.version = 11 : i64} {
  func.func @output_conv_kernel(%arg0: i32, %arg1: memref<2x10x10x4xf32, #tpu.memory_space<vmem>>, %arg2: memref<36x8xf32, #tpu.memory_space<vmem>>, %arg3: memref<36x8xf32, #tpu.memory_space<vmem>>, %arg4: memref<1x8xf32, #tpu.memory_space<vmem>>, %arg5: memref<1x8xf32, #tpu.memory_space<vmem>>, %arg6: memref<128x8xf32, #tpu.memory_space<vmem>>, %arg7: memref<128x8xf32, #tpu.memory_space<vmem>>) attributes {dimension_semantics = [#tpu.dimension_semantics<arbitrary>], iteration_bounds = array<i64: 1>, scalar_prefetch = 0 : i64, scratch_operands = 0 : i64, tpu.core_type = #tpu.core_type<tc>, window_params = [{pipeline_mode = #tpu.pipeline_mode<synchronous>, transform_indices = @transform_0, window_bounds = array<i64: 2, 10, 10, 4>}, {pipeline_mode = #tpu.pipeline_mode<synchronous>, transform_indices = @transform_1, window_bounds = array<i64: 36, 8>}, {pipeline_mode = #tpu.pipeline_mode<synchronous>, transform_indices = @transform_2, window_bounds = array<i64: 36, 8>}, {pipeline_mode = #tpu.pipeline_mode<synchronous>, transform_indices = @transform_3, window_bounds = array<i64: 1, 8>}, {pipeline_mode = #tpu.pipeline_mode<synchronous>, transform_indices = @transform_4, window_bounds = array<i64: 1, 8>}, {pipeline_mode = #tpu.pipeline_mode<synchronous>, transform_indices = @transform_5, window_bounds = array<i64: 128, 8>}, {pipeline_mode = #tpu.pipeline_mode<synchronous>, transform_indices = @transform_6, window_bounds = array<i64: 128, 8>}]} {
    %c0 = arith.constant 0 : index
    %c0_0 = arith.constant 0 : index
    %c0_1 = arith.constant 0 : index
    %c0_2 = arith.constant 0 : index
    %0 = vector.load %arg1[%c0, %c0_0, %c0_1, %c0_2] : memref<2x10x10x4xf32, #tpu.memory_space<vmem>>, vector<2x10x10x4xf32>
    %1 = vector.extract_strided_slice %0 {offsets = [0, 0, 0, 0], sizes = [2, 8, 8, 4], strides = [1, 1, 1, 1]} : vector<2x10x10x4xf32> to vector<2x8x8x4xf32>
    %2 = vector.extract_strided_slice %0 {offsets = [0, 0, 1, 0], sizes = [2, 8, 8, 4], strides = [1, 1, 1, 1]} : vector<2x10x10x4xf32> to vector<2x8x8x4xf32>
    %3 = vector.extract_strided_slice %0 {offsets = [0, 0, 2, 0], sizes = [2, 8, 8, 4], strides = [1, 1, 1, 1]} : vector<2x10x10x4xf32> to vector<2x8x8x4xf32>
    %4 = vector.extract_strided_slice %0 {offsets = [0, 1, 0, 0], sizes = [2, 8, 8, 4], strides = [1, 1, 1, 1]} : vector<2x10x10x4xf32> to vector<2x8x8x4xf32>
    %5 = vector.extract_strided_slice %0 {offsets = [0, 1, 1, 0], sizes = [2, 8, 8, 4], strides = [1, 1, 1, 1]} : vector<2x10x10x4xf32> to vector<2x8x8x4xf32>
    %6 = vector.extract_strided_slice %0 {offsets = [0, 1, 2, 0], sizes = [2, 8, 8, 4], strides = [1, 1, 1, 1]} : vector<2x10x10x4xf32> to vector<2x8x8x4xf32>
    %7 = vector.extract_strided_slice %0 {offsets = [0, 2, 0, 0], sizes = [2, 8, 8, 4], strides = [1, 1, 1, 1]} : vector<2x10x10x4xf32> to vector<2x8x8x4xf32>
    %8 = vector.extract_strided_slice %0 {offsets = [0, 2, 1, 0], sizes = [2, 8, 8, 4], strides = [1, 1, 1, 1]} : vector<2x10x10x4xf32> to vector<2x8x8x4xf32>
    %9 = vector.extract_strided_slice %0 {offsets = [0, 2, 2, 0], sizes = [2, 8, 8, 4], strides = [1, 1, 1, 1]} : vector<2x10x10x4xf32> to vector<2x8x8x4xf32>
    %10 = tpu.concatenate %1, %2, %3, %4, %5, %6, %7, %8, %9 in 3 : vector<2x8x8x4xf32>, vector<2x8x8x4xf32>, vector<2x8x8x4xf32>, vector<2x8x8x4xf32>, vector<2x8x8x4xf32>, vector<2x8x8x4xf32>, vector<2x8x8x4xf32>, vector<2x8x8x4xf32>, vector<2x8x8x4xf32> -> vector<2x8x8x36xf32>
    %11 = vector.shape_cast %10 : vector<2x8x8x36xf32> to vector<128x36xf32>
    %c0_3 = arith.constant 0 : index
    %c0_4 = arith.constant 0 : index
    %12 = vector.load %arg2[%c0_3, %c0_4] : memref<36x8xf32, #tpu.memory_space<vmem>>, vector<36x8xf32>
    %cst = arith.constant dense<0.000000e+00> : vector<128x8xf32>
    %13 = tpu.matmul %11, %12, %cst {dimension_numbers = #tpu.dot_dimension_numbers<[1], [0], [0], [1], [0, 0, 1, 1], [], []>} : vector<128x36xf32>, vector<36x8xf32>, vector<128x8xf32> -> vector<128x8xf32>
    %c0_5 = arith.constant 0 : index
    %c0_6 = arith.constant 0 : index
    %14 = vector.load %arg4[%c0_5, %c0_6] : memref<1x8xf32, #tpu.memory_space<vmem>>, vector<1x8xf32>
    %15 = vector.broadcast %14 : vector<1x8xf32> to vector<128x8xf32>
    %16 = arith.addf %13, %15 : vector<128x8xf32>
    %c0_7 = arith.constant 0 : index
    %c0_8 = arith.constant 0 : index
    %17 = vector.load %arg3[%c0_7, %c0_8] : memref<36x8xf32, #tpu.memory_space<vmem>>, vector<36x8xf32>
    %cst_9 = arith.constant dense<0.000000e+00> : vector<128x8xf32>
    %18 = tpu.matmul %11, %17, %cst_9 {dimension_numbers = #tpu.dot_dimension_numbers<[1], [0], [0], [1], [0, 0, 1, 1], [], []>} : vector<128x36xf32>, vector<36x8xf32>, vector<128x8xf32> -> vector<128x8xf32>
    %c0_10 = arith.constant 0 : index
    %c0_11 = arith.constant 0 : index
    %19 = vector.load %arg5[%c0_10, %c0_11] : memref<1x8xf32, #tpu.memory_space<vmem>>, vector<1x8xf32>
    %20 = vector.broadcast %19 : vector<1x8xf32> to vector<128x8xf32>
    %21 = arith.addf %18, %20 : vector<128x8xf32>
    %c0_12 = arith.constant 0 : index
    %c0_13 = arith.constant 0 : index
    %22 = vector.load %arg6[%c0_12, %c0_13] : memref<128x8xf32, #tpu.memory_space<vmem>>, vector<128x8xf32>
    tpu.vector_store %arg6[%c0_12, %c0_13], %16 {strides = array<i32>} : memref<128x8xf32, #tpu.memory_space<vmem>>, vector<128x8xf32>,
    %c0_14 = arith.constant 0 : index
    %c0_15 = arith.constant 0 : index
    %23 = vector.load %arg7[%c0_14, %c0_15] : memref<128x8xf32, #tpu.memory_space<vmem>>, vector<128x8xf32>
    tpu.vector_store %arg7[%c0_14, %c0_15], %21 {strides = array<i32>} : memref<128x8xf32, #tpu.memory_space<vmem>>, vector<128x8xf32>,
    return
  }
  func.func @transform_0(%arg0: i32) -> (i32, i32, i32, i32) {
    %c0_i32 = arith.constant 0 : i32
    %c0_i32_0 = arith.constant 0 : i32
    %c0_i32_1 = arith.constant 0 : i32
    %c0_i32_2 = arith.constant 0 : i32
    %c0_i32_3 = arith.constant 0 : i32
    return %c0_i32, %c0_i32_0, %c0_i32_1, %c0_i32_2 : i32, i32, i32, i32
  }
  func.func @transform_1(%arg0: i32) -> (i32, i32) {
    %c0_i32 = arith.constant 0 : i32
    %c0_i32_0 = arith.constant 0 : i32
    %c0_i32_1 = arith.constant 0 : i32
    return %c0_i32, %c0_i32_0 : i32, i32
  }
  func.func @transform_2(%arg0: i32) -> (i32, i32) {
    %c0_i32 = arith.constant 0 : i32
    %c0_i32_0 = arith.constant 0 : i32
    %c0_i32_1 = arith.constant 0 : i32
    return %c0_i32, %c0_i32_0 : i32, i32
  }
  func.func @transform_3(%arg0: i32) -> (i32, i32) {
    %c0_i32 = arith.constant 0 : i32
    %c0_i32_0 = arith.constant 0 : i32
    %c0_i32_1 = arith.constant 0 : i32
    return %c0_i32, %c0_i32_0 : i32, i32
  }
  func.func @transform_4(%arg0: i32) -> (i32, i32) {
    %c0_i32 = arith.constant 0 : i32
    %c0_i32_0 = arith.constant 0 : i32
    %c0_i32_1 = arith.constant 0 : i32
    return %c0_i32, %c0_i32_0 : i32, i32
  }
  func.func @transform_5(%arg0: i32) -> (i32, i32) {
    %c0_i32 = arith.constant 0 : i32
    %c0_i32_0 = arith.constant 0 : i32
    %c0_i32_1 = arith.constant 0 : i32
    return %c0_i32, %c0_i32_0 : i32, i32
  }
  func.func @transform_6(%arg0: i32) -> (i32, i32) {
    %c0_i32 = arith.constant 0 : i32
    %c0_i32_0 = arith.constant 0 : i32
    %c0_i32_1 = arith.constant 0 : i32
    return %c0_i32, %c0_i32_0 : i32, i32
  }
}

</mosaic_0001>

<bundles_post_ra>
// kernel: tpu_custom_call.1
= control target key start
LH: loop header
LB: loop body
LE: loop exit
PB: predicated region body
PF: predicated region fallthrough
CT: control target
= control target key end

     0   :  { %vm191_vm0 = vcmask 1045504   ;;  %vm94_vm1 = vcmask 1046528   ;;  %s1308_s29 = smov 8   ;;  %s1309_s30 = smov 4   ;;  %vm805_vm2 = vcmask 1043456   ;;  %vm608_vm3 = vcmask 31744   ;;  %s2204_s0 = inlined_call_operand.vmem [shape: f32[2,10,10,4], index: 0, kind: input, shape index: {}]   ;;  %s2205_s1 = inlined_call_operand.vmem [shape: f32[36,8], index: 1, kind: input, shape index: {}]   ;;  %s2206_s2 = inlined_call_operand.vmem [shape: f32[36,8], index: 2, kind: input, shape index: {}]   ;;  %s2207_s3 = inlined_call_operand.vmem [shape: f32[1,8], index: 3, kind: input, shape index: {}]   ;;  %s2208_s4 = inlined_call_operand.vmem [shape: f32[1,8], index: 4, kind: input, shape index: {}]   ;;  %s2209_s5 = inlined_call_operand.vmem [shape: f32[128,8], index: 5, kind: output, shape index: {0}]   ;;  %s2210_s6 = inlined_call_operand.vmem [shape: f32[128,8], index: 6, kind: output, shape index: {1}]  }
   0x1   :  { %v1354_v0 = vld [vmem:[%s2204_s0] sm:$0xff]  ;;  %v23_v1 = vld [vmem:[%s2204_s0 + $0x8] sm:$0x3]  ;;  %v1362_v2 = vld [vmem:[%s2204_s0 + $0x10] sm:$0xff]  ;;  %s1310_s11 = smov 12   ;;  %s1311_s16 = smov 16  }
   0x2   :  { %v192_v3 = vrot.slane %v1354_v0, 2  ;;  %v193_v4 = vrot.slane %v23_v1, 2  ;;  %v95_v5 = vrot.slane %v1354_v0, 1  ;;  %v96_v6 = vrot.slane %v23_v1, 1  ;;  %v25_v7 = vld [vmem:[%s2204_s0 + $0x18] sm:$0x3] }
   0x3   :  { %v195_v8 = vrot.slane %v1362_v2, 2  ;;  %v196_v9 = vrot.slane %v25_v7, 2  ;;  %v98_v10 = vrot.slane %v1362_v2, 1  ;;  %v99_v11 = vrot.slane %v25_v7, 1  ;;  %v1380_v16 = vld [vmem:[%s2204_s0 + $0x20] sm:$0xff]  ;;  %v1396_v21 = vld [vmem:[%s2204_s0 + $0x30] sm:$0xff] }
   0x4   :  { %v194_v12 = vsel %vm191_vm0, %v192_v3, %v193_v4  ;;  %v97_v13 = vsel %vm94_vm1, %v95_v5, %v96_v6  ;;  %v27_v17 = vld [vmem:[%s2204_s0 + $0x28] sm:$0x3]  ;;  %v101_v18 = vrot.slane %v1380_v16, 1  ;;  %v29_v22 = vld [vmem:[%s2204_s0 + $0x38] sm:$0x3]  ;;  %v198_v23 = vrot.slane %v1380_v16, 2 }
   0x5   :  { %240 = vrot.lane.b32.xlu1 %v194_v12, %s1308_s29  ;;  %143 = vrot.lane.b32.xlu0 %v97_v13, %s1309_s30  ;;  %v197_v14 = vsel %vm191_vm0, %v195_v8, %v196_v9  ;;  %v100_v15 = vsel %vm94_vm1, %v98_v10, %v99_v11  ;;  %v102_v19 = vrot.slane %v27_v17, 1  ;;  %v199_v24 = vrot.slane %v27_v17, 2  ;;  %s1312_s17 = smov 20   ;;  %s1313_s18 = smov 24   ;;  %v748_v32 = vld [vmem:[%s2205_s1 + $0x20] sm:$0xf] }
   0x6   :  { %v104_v25 = vrot.slane %v1396_v21, 1  ;;  %v105_v26 = vrot.slane %v29_v22, 1  ;;  %v201_v29 = vrot.slane %v1396_v21, 2  ;;  %v202_v30 = vrot.slane %v29_v22, 2  ;;  %v958_v33 = vld [vmem:[%s2206_s2 + $0x20] sm:$0xf]  ;;  %1232 = vmatprep.subr.msk.mxu0 %vm805_vm2, %v748_v32 }
   0x7   :  { %v103_v20 = vsel %vm94_vm1, %v101_v18, %v102_v19  ;;  %v200_v27 = vsel %vm191_vm0, %v198_v23, %v199_v24  ;;  %1266 = vmatprep.subr.msk.mxu1 %vm805_vm2, %v958_v33  ;;  %1233 = vmatpush3.msk.msra.mxu0 %vm805_vm2, %v748_v32  ;;  %v747_v34 = vld [vmem:[%s2205_s1 + $0x18] sm:$0xff]  ;;  %v746_v36 = vld [vmem:[%s2205_s1 + $0x10] sm:$0xff]  ;;  %v745_v38 = vld [vmem:[%s2205_s1 + $0x8] sm:$0xff]  ;;  %s1314_s14 = smov 28   ;;  %s1315_s26 = smov 32   ;;  %vm625_vm4 = vcmask 64512  }
   0x8   :  { %v106_v28 = vsel %vm94_vm1, %v104_v25, %v105_v26  ;;  %v203_v31 = vsel %vm191_vm0, %v201_v29, %v202_v30  ;;  %1267 = vmatpush3.msk.msra.mxu1 %vm805_vm2, %v958_v33  ;;  %v957_v35 = vld [vmem:[%s2206_s2 + $0x18] sm:$0xff]  ;;  %1234 = vmatprep.subr.mxu0 %v747_v34  ;;  %v956_v37 = vld [vmem:[%s2206_s2 + $0x10] sm:$0xff]  ;;  %v955_v39 = vld [vmem:[%s2206_s2 + $0x8] sm:$0xff]  ;;  %vm642_vm5 = vcmask 97280   ;;  %vm659_vm6 = vcmask 130048  }
   0x9   :  { %242 = vrot.lane.b32.xlu1 %v197_v14, %s1308_s29  ;;  %145 = vrot.lane.b32.xlu0 %v100_v15, %s1309_s30  ;;  %v1449_v40 = vld [vmem:[%s2204_s0 + $0x40] sm:$0xff]  ;;  %v31_v41 = vld [vmem:[%s2204_s0 + $0x48] sm:$0x3]  ;;  %vm676_vm7 = vcmask 162816   ;;  %vm693_vm8 = vcmask 195584   ;;  %vm710_vm9 = vcmask 228352  }
   0xa   :  { %1268 = vmatprep.subr.mxu1 %v957_v35  ;;  %1235 = vmatpush3.msra.mxu0 %v747_v34  ;;  %v744_v42 = vld [vmem:[%s2205_s1] sm:$0xff]  ;;  %v107_v44 = vrot.slane %v1449_v40, 1  ;;  %v108_v45 = vrot.slane %v31_v41, 1  ;;  %v1470_v47 = vld [vmem:[%s2204_s0 + $0x50] sm:$0xff]  ;;  %v33_v48 = vld [vmem:[%s2204_s0 + $0x58] sm:$0x3] }
   0xb   :  { %1269 = vmatpush3.msra.mxu1 %v957_v35  ;;  %1236 = vmatprep.subr.mxu0 %v746_v36  ;;  %v954_v43 = vld [vmem:[%s2206_s2] sm:$0xff]  ;;  %v204_v49 = vrot.slane %v1449_v40, 2  ;;  %v205_v50 = vrot.slane %v31_v41, 2  ;;  %v110_v51 = vrot.slane %v1470_v47, 1  ;;  %v111_v52 = vrot.slane %v33_v48, 1  ;;  %v1514_v63 = vld [vmem:[%s2204_s0 + $0x70] sm:$0xff] }
   0xc   :  { %1270 = vmatprep.subr.mxu1 %v956_v37  ;;  %1237 = vmatpush3.msra.mxu0 %v746_v36  ;;  %v109_v46 = vsel %vm94_vm1, %v107_v44, %v108_v45  ;;  %v207_v55 = vrot.slane %v1470_v47, 2  ;;  %v208_v56 = vrot.slane %v33_v48, 2  ;;  %v1499_v58 = vld [vmem:[%s2204_s0 + $0x60] sm:$0xff]  ;;  %v35_v59 = vld [vmem:[%s2204_s0 + $0x68] sm:$0x3]  ;;  %v116_v5 = vrot.slane %v1514_v63, 1 }
   0xd   :  { %292 = vrot.lane.b32.xlu1 %v1380_v16, %s1310_s11  ;;  %290 = vrot.lane.b32.xlu0 %v1362_v2, %s1310_s11  ;;  %v206_v53 = vsel %vm191_vm0, %v204_v49, %v205_v50  ;;  %v112_v54 = vsel %vm94_vm1, %v110_v51, %v111_v52  ;;  %v113_v60 = vrot.slane %v1499_v58, 1  ;;  %v114_v61 = vrot.slane %v35_v59, 1  ;;  %v37_v1 = vld [vmem:[%s2204_s0 + $0x78] sm:$0x3]  ;;  %v38_v12 = vld [vmem:[%s2204_s0 + $0x80] sm:$0xff] }
   0xe   :  { %1271 = vmatpush3.msra.mxu1 %v956_v37  ;;  %1238 = vmatprep.subr.mxu0 %v745_v38  ;;  %v209_v57 = vsel %vm191_vm0, %v207_v55, %v208_v56  ;;  %v210_v3 = vrot.slane %v1499_v58, 2  ;;  %v211_v4 = vrot.slane %v35_v59, 2  ;;  %v117_v6 = vrot.slane %v37_v1, 1  ;;  %v39_v13 = vld [vmem:[%s2204_s0 + $0x88] sm:$0x3]  ;;  %v1564_v24 = vld [vmem:[%s2204_s0 + $0xb0] sm:$0xff] }
   0xf   :  { %1272 = vmatprep.subr.mxu1 %v955_v39  ;;  %1239 = vmatpush3.msra.mxu0 %v745_v38  ;;  %v115_v62 = vsel %vm94_vm1, %v113_v60, %v114_v61  ;;  %v213_v9 = vrot.slane %v1514_v63, 2  ;;  %v214_v10 = vrot.slane %v37_v1, 2  ;;  %v340_v17 = vrot.slane %v38_v12, 1  ;;  %v45_v25 = vld [vmem:[%s2204_s0 + $0xb8] sm:$0x3]  ;;  %v40_v45 = vld [vmem:[%s2204_s0 + $0x90] sm:$0xff] }
  0x10   :  { %1273 = vmatpush3.msra.mxu1 %v955_v39  ;;  %1240 = vmatprep.subr.mxu0 %v744_v42  ;;  %v212_v7 = vsel %vm191_vm0, %v210_v3, %v211_v4  ;;  %v118_v8 = vsel %vm94_vm1, %v116_v5, %v117_v6  ;;  %v341_v18 = vrot.slane %v39_v13, 1  ;;  %v123_v29 = vrot.slane %v45_v25, 1  ;;  %v41_v49 = vld [vmem:[%s2204_s0 + $0x98] sm:$0x3]  ;;  %v1608_v51 = vld [vmem:[%s2204_s0 + $0xc0] sm:$0xff]  ;;  %v1630_v6 = vld [vmem:[%s2204_s0 + $0xd0] sm:$0xff] }
  0x11   :  { %147 = vrot.lane.b32.xlu1 %v103_v20, %s1309_s30  ;;  %346 = vrot.lane.b32.xlu0 %v100_v15, %s1311_s16  ;;  %v215_v11 = vsel %vm191_vm0, %v213_v9, %v214_v10  ;;  %v43_v15 = vld [vmem:[%s2204_s0 + $0xa8] sm:$0x3]  ;;  %v394_v32 = vrot.slane %v38_v12, 2  ;;  %v395_v33 = vrot.slane %v39_v13, 2  ;;  %v219_v37 = vrot.slane %v1564_v24, 2 }
  0x12   :  { %1274 = vmatprep.subr.mxu1 %v954_v43  ;;  %1241 = vmatpush3.msra.mxu0 %v744_v42  ;;  %v342_v22 = vsel %vm94_vm1, %v340_v17, %v341_v18  ;;  %v220_v38 = vrot.slane %v45_v25, 2  ;;  %v500_v50 = vrot.slane %v40_v45, 1  ;;  %v501_v52 = vrot.slane %v41_v49, 1  ;;  %v47_v55 = vld [vmem:[%s2204_s0 + $0xc8] sm:$0x3] }
  0x13   :  { %1275 = vmatpush3.msra.mxu1 %v954_v43  ;;  %v396_v36 = vsel %vm191_vm0, %v394_v32, %v395_v33  ;;  %v126_v59 = vrot.slane %v47_v55, 1  ;;  %v555_v1 = vrot.slane %v41_v49, 2  ;;  %v222_v9 = vrot.slane %v1608_v51, 2 }
  0x14   :  { %v221_v42 = vsel %vm191_vm0, %v219_v37, %v220_v38  ;;  %v502_v56 = vsel %vm94_vm1, %v500_v50, %v501_v52  ;;  %v223_v10 = vrot.slane %v47_v55, 2  ;;  %v225_v25 = vrot.slane %v1630_v6, 2  ;;  %v51_v52 = vld [vmem:[%s2204_s0 + $0xe8] sm:$0x3] }
  0x15   :  { %400 = vrot.lane.b32.xlu1 %v197_v14, %s1312_s17  ;;  %348 = vrot.lane.b32.xlu0 %v103_v20, %s1311_s16  ;;  %v1549_v14 = vld [vmem:[%s2204_s0 + $0xa0] sm:$0xff]  ;;  %vm727_vm10 = vcmask 261120   ;;  %vm756_vm11 = vcmask 293888   ;;  %v132_v55 = vrot.slane %v51_v52, 1 }
  0x16   :  { %v119_v19 = vrot.slane %v1549_v14, 1  ;;  %v216_v26 = vrot.slane %v1549_v14, 2  ;;  %v224_v17 = vsel %vm191_vm0, %v222_v9, %v223_v10 }
  0x19   :  { %244 = vrot.lane.b32.xlu1 %v200_v27, %s1308_s29  ;;  %149 = vrot.lane.b32.xlu0 %v106_v28, %s1309_s30 }
  0x1d   :  { %450 = vrot.lane.b32.xlu1 %v1380_v16, %s1313_s18  ;;  %402 = vrot.lane.b32.xlu0 %v200_v27, %s1312_s17 }
  0x21   :  { %294 = vrot.lane.b32.xlu1 %v1396_v21, %s1310_s11  ;;  %246 = vrot.lane.b32.xlu0 %v203_v31, %s1308_s29 }
  0x25   :  { %506 = vrot.lane.b32.xlu1 %v103_v20, %s1314_s14  ;;  %452 = vrot.lane.b32.xlu0 %v1396_v21, %s1313_s18  ;;  %v120_v20 = vrot.slane %v43_v15, 1 }
  0x27   :  { %v121_v23 = vsel %vm94_vm1, %v119_v19, %v120_v20 }
  0x29   :  { %350 = vrot.lane.b32.xlu1 %v106_v28, %s1311_s16  ;;  %296 = vrot.lane.b32.xlu0 %v1449_v40, %s1310_s11 }
  0x2d   :  { %560 = vrot.lane.b32.xlu1 %v200_v27, %s1315_s26  ;;  %508 = vrot.lane.b32.xlu0 %v106_v28, %s1314_s14  ;;  %v217_v27 = vrot.slane %v43_v15, 2  ;;  %v122_v28 = vrot.slane %v1564_v24, 1 }
  0x2f   :  { %v218_v30 = vsel %vm191_vm0, %v216_v26, %v217_v27 }
  0x31   :  { %352 = vrot.lane.b32.xlu1 %v109_v46, %s1311_s16  ;;  %151 = vrot.lane.b32.xlu0 %v109_v46, %s1309_s30 }
  0x35   :  { %562 = vrot.lane.b32.xlu1 %v203_v31, %s1315_s26  ;;  %404 = vrot.lane.b32.xlu0 %v203_v31, %s1312_s17  ;;  %v124_v31 = vsel %vm94_vm1, %v122_v28, %v123_v29 }
  0x39   :  { %248 = vrot.lane.b32.xlu1 %v206_v53, %s1308_s29  ;;  %153 = vrot.lane.b32.xlu0 %v112_v54, %s1309_s30 }
  0x3d   :  { %454 = vrot.lane.b32.xlu1 %v1449_v40, %s1313_s18  ;;  %406 = vrot.lane.b32.xlu0 %v206_v53, %s1312_s17 }
  0x41   :  { %298 = vrot.lane.b32.xlu1 %v1470_v47, %s1310_s11  ;;  %250 = vrot.lane.b32.xlu0 %v209_v57, %s1308_s29 }
  0x45   :  { %510 = vrot.lane.b32.xlu1 %v109_v46, %s1314_s14  ;;  %456 = vrot.lane.b32.xlu0 %v1470_v47, %s1313_s18 }
  0x49   :  { %354 = vrot.lane.b32.xlu1 %v112_v54, %s1311_s16  ;;  %300 = vrot.lane.b32.xlu0 %v1499_v58, %s1310_s11 }
  0x4d   :  { %564 = vrot.lane.b32.xlu1 %v206_v53, %s1315_s26  ;;  %512 = vrot.lane.b32.xlu0 %v112_v54, %s1314_s14 }
  0x51   :  { %356 = vrot.lane.b32.xlu1 %v115_v62, %s1311_s16  ;;  %155 = vrot.lane.b32.xlu0 %v115_v62, %s1309_s30 }
  0x55   :  { %566 = vrot.lane.b32.xlu1 %v209_v57, %s1315_s26  ;;  %408 = vrot.lane.b32.xlu0 %v209_v57, %s1312_s17  ;;  %v125_v57 = vrot.slane %v1608_v51, 1 }
  0x57   :  { %v127_v3 = vsel %vm94_vm1, %v125_v57, %v126_v59 }
  0x59   :  { %252 = vrot.lane.b32.xlu1 %v212_v7, %s1308_s29  ;;  %157 = vrot.lane.b32.xlu0 %v118_v8, %s1309_s30 }
  0x5d   :  { %458 = vrot.lane.b32.xlu1 %v1499_v58, %s1313_s18  ;;  %410 = vrot.lane.b32.xlu0 %v212_v7, %s1312_s17 }
  0x61   :  { %302 = vrot.lane.b32.xlu1 %v1514_v63, %s1310_s11  ;;  %254 = vrot.lane.b32.xlu0 %v215_v11, %s1308_s29 }
  0x65   :  { %514 = vrot.lane.b32.xlu1 %v115_v62, %s1314_s14  ;;  %460 = vrot.lane.b32.xlu0 %v1514_v63, %s1313_s18  ;;  %v554_v62 = vrot.slane %v40_v45, 2 }
  0x69   :  { %358 = vrot.lane.b32.xlu1 %v118_v8, %s1311_s16  ;;  %304 = vrot.lane.b32.xlu0 %v38_v12, %s1310_s11 }
  0x6d   :  { %568 = vrot.lane.b32.xlu1 %v212_v7, %s1315_s26  ;;  %516 = vrot.lane.b32.xlu0 %v118_v8, %s1314_s14  ;;  %v49_v7 = vld [vmem:[%s2204_s0 + $0xd8] sm:$0x3]  ;;  %v556_v8 = vsel %vm191_vm0, %v554_v62, %v555_v1 }
  0x6e   :  { %v226_v26 = vrot.slane %v49_v7, 2 }
  0x70   :  { %v227_v32 = vsel %vm191_vm0, %v225_v25, %v226_v26 }
  0x71   :  { %360 = vrot.lane.b32.xlu1 %v342_v22, %s1311_s16  ;;  %159 = vrot.lane.b32.xlu0 %v121_v23, %s1309_s30 }
  0x75   :  { %570 = vrot.lane.b32.xlu1 %v215_v11, %s1315_s26  ;;  %412 = vrot.lane.b32.xlu0 %v215_v11, %s1312_s17  ;;  %v128_v11 = vrot.slane %v1630_v6, 1 }
  0x77   :  { %v1577_v34 = vpop.permute.xlu1 %240  ;;  %v144_v35 = vpop.permute.xlu0 %143 }
  0x78   :  { %v609_v19 = vsel %vm608_vm3, %v1354_v0, %v144_v35 }
  0x79   :  { %256 = vrot.lane.b32.xlu1 %v218_v30, %s1308_s29  ;;  %161 = vrot.lane.b32.xlu0 %v124_v31, %s1309_s30  ;;  %v626_v23 = vsel %vm625_vm4, %v609_v19, %v1577_v34 }
  0x7b   :  { %v1583_v39 = vpop.permute.xlu1 %242  ;;  %v1585_v41 = vpop.permute.xlu0 %145 }
  0x7c   :  { %v610_v33 = vsel %vm608_vm3, %v1362_v2, %v1585_v41 }
  0x7d   :  { %462 = vrot.lane.b32.xlu1 %v38_v12, %s1313_s18  ;;  %414 = vrot.lane.b32.xlu0 %v396_v36, %s1312_s17  ;;  %v129_v12 = vrot.slane %v49_v7, 1  ;;  %v627_v38 = vsel %vm625_vm4, %v610_v33, %v1583_v39  ;;  %v229_v7 = vrot.slane %v51_v52, 2 }
  0x7f   :  { %v1590_v43 = vpop.permute.xlu1 %292  ;;  %v291_v44 = vpop.permute.xlu0 %290  ;;  %v130_v18 = vsel %vm94_vm1, %v128_v11, %v129_v12 }
  0x80   :  { %v643_v27 = vsel %vm642_vm5, %v626_v23, %v291_v44  ;;  %v644_v2 = vsel %vm642_vm5, %v627_v38, %v1590_v43  ;;  %v1695_v43 = vld [vmem:[%s2204_s0 + $0xe0] sm:$0xff] }
  0x81   :  { %306 = vrot.lane.b32.xlu1 %v1564_v24, %s1310_s11  ;;  %258 = vrot.lane.b32.xlu0 %v221_v42, %s1308_s29 }
  0x83   :  { %v1598_v46 = vpop.permute.xlu1 %147  ;;  %v347_v48 = vpop.permute.xlu0 %346 }
  0x84   :  { %v660_v29 = vsel %vm659_vm6, %v643_v27, %v347_v48 }
  0x85   :  { %518 = vrot.lane.b32.xlu1 %v342_v22, %s1314_s14  ;;  %464 = vrot.lane.b32.xlu0 %v40_v45, %s1313_s18 }
  0x87   :  { %v401_v53 = vpop.permute.xlu1 %400  ;;  %v1610_v54 = vpop.permute.xlu0 %348 }
  0x88   :  { %v677_v30 = vsel %vm676_vm7, %v660_v29, %v401_v53  ;;  %v661_v44 = vsel %vm659_vm6, %v644_v2, %v1610_v54  ;;  %v131_v54 = vrot.slane %v1695_v43, 1 }
  0x89   :  { %362 = vrot.lane.b32.xlu1 %v124_v31, %s1311_s16  ;;  %308 = vrot.lane.b32.xlu0 %v1608_v51, %s1310_s11 }
  0x8a   :  { %v133_v59 = vsel %vm94_vm1, %v131_v54, %v132_v55  ;;  %v1808_v55 = vld [vmem:[%s2204_s0 + $0x110] sm:$0xff] }
  0x8b   :  { %v1620_v60 = vpop.permute.xlu1 %244  ;;  %v1622_v61 = vpop.permute.xlu0 %149 }
  0x8d   :  { %572 = vrot.lane.b32.xlu1 %v396_v36, %s1315_s26  ;;  %520 = vrot.lane.b32.xlu0 %v502_v56, %s1314_s14 }
  0x8f   :  { %v451_v4 = vpop.permute.xlu1 %450  ;;  %v403_v5 = vpop.permute.xlu0 %402 }
  0x90   :  { %v694_v31 = vsel %vm693_vm8, %v677_v30, %v451_v4  ;;  %v678_v45 = vsel %vm676_vm7, %v661_v44, %v403_v5  ;;  %v53_v4 = vld [vmem:[%s2204_s0 + $0xf8] sm:$0x3]  ;;  %v228_v5 = vrot.slane %v1695_v43, 2 }
  0x91   :  { %364 = vrot.lane.b32.xlu1 %v127_v3, %s1311_s16  ;;  %163 = vrot.lane.b32.xlu0 %v127_v3, %s1309_s30  ;;  %v135_v9 = vrot.slane %v53_v4, 1  ;;  %v232_v25 = vrot.slane %v53_v4, 2  ;;  %v140_v4 = vrot.slane %v1808_v55, 1 }
  0x92   :  { %v230_v12 = vsel %vm191_vm0, %v228_v5, %v229_v7 }
  0x93   :  { %v1640_v13 = vpop.permute.xlu1 %294  ;;  %v1642_v15 = vpop.permute.xlu0 %246 }
  0x95   :  { %574 = vrot.lane.b32.xlu1 %v556_v8, %s1315_s26  ;;  %416 = vrot.lane.b32.xlu0 %v221_v42, %s1312_s17 }
  0x97   :  { %v507_v20 = vpop.permute.xlu1 %506  ;;  %v453_v22 = vpop.permute.xlu0 %452 }
  0x98   :  { %v711_v34 = vsel %vm710_vm9, %v694_v31, %v507_v20  ;;  %v695_v39 = vsel %vm693_vm8, %v678_v45, %v453_v22  ;;  %v611_v20 = vsel %vm608_vm3, %v1380_v16, %v1598_v46 }
  0x99   :  { %260 = vrot.lane.b32.xlu1 %v224_v17, %s1308_s29  ;;  %165 = vrot.lane.b32.xlu0 %v130_v18, %s1309_s30  ;;  %v628_v22 = vsel %vm625_vm4, %v611_v20, %v1620_v60 }
  0x9a   :  { %v645_v26 = vsel %vm642_vm5, %v628_v22, %v1640_v13  ;;  %v237_v22 = vrot.slane %v1808_v55, 2 }
  0x9b   :  { %v1656_v0 = vpop.permute.xlu1 %350  ;;  %v1658_v28 = vpop.permute.xlu0 %296 }
  0x9c   :  { %v662_v16 = vsel %vm659_vm6, %v645_v26, %v1656_v0  ;;  %v612_v0 = vsel %vm608_vm3, %v1396_v21, %v1622_v61 }
  0x9d   :  { %466 = vrot.lane.b32.xlu1 %v1608_v51, %s1313_s18  ;;  %418 = vrot.lane.b32.xlu0 %v224_v17, %s1312_s17 }
  0x9f   :  { %v561_v35 = vpop.permute.xlu1 %560  ;;  %v509_v36 = vpop.permute.xlu0 %508 }
  0xa0   :  { %v728_v37 = vsel %vm727_vm10, %v711_v34, %v561_v35  ;;  %v712_v48 = vsel %vm710_vm9, %v695_v39, %v509_v36  ;;  %v629_v34 = vsel %vm625_vm4, %v612_v0, %v1642_v15 }
  0xa1   :  { %310 = vrot.lane.b32.xlu1 %v1630_v6, %s1310_s11  ;;  %262 = vrot.lane.b32.xlu0 %v227_v32, %s1308_s29  ;;  %v646_v35 = vsel %vm642_vm5, %v629_v34, %v1658_v28  ;;  %v1785_v28 = vld [vmem:[%s2204_s0 + $0x100] sm:$0xff] }
  0xa2   :  { %1242 = vmatprep.mubr.msk.f32.mxu0 %vm756_vm11, %v728_v37  ;;  %1276 = vmatprep.mubr.msk.f32.mxu1 %vm756_vm11, %v728_v37  ;;  %v137_v39 = vrot.slane %v1785_v28, 1 }
  0xa3   :  { %v1681_v41 = vpop.permute.xlu1 %352  ;;  %v1683_v42 = vpop.permute.xlu0 %151 }
  0xa4   :  { %v663_v21 = vsel %vm659_vm6, %v646_v35, %v1681_v41  ;;  %v55_v41 = vld [vmem:[%s2204_s0 + $0x108] sm:$0x3] }
  0xa5   :  { %522 = vrot.lane.b32.xlu1 %v127_v3, %s1314_s14  ;;  %468 = vrot.lane.b32.xlu0 %v1630_v6, %s1313_s18  ;;  %v1718_v3 = vld [vmem:[%s2204_s0 + $0xf0] sm:$0xff] }
  0xa6   :  { %v134_v8 = vrot.slane %v1718_v3, 1  ;;  %v231_v23 = vrot.slane %v1718_v3, 2 }
  0xa7   :  { %v563_v49 = vpop.permute.xlu1 %562  ;;  %v405_v50 = vpop.permute.xlu0 %404 }
  0xa8   :  { %v729_v53 = vsel %vm727_vm10, %v712_v48, %v563_v49  ;;  %v679_v46 = vsel %vm676_vm7, %v662_v16, %v405_v50  ;;  %v233_v30 = vsel %vm191_vm0, %v231_v23, %v232_v25  ;;  %v138_v48 = vrot.slane %v55_v41, 1 }
  0xa9   :  { %366 = vrot.lane.b32.xlu1 %v130_v18, %s1311_s16  ;;  %312 = vrot.lane.b32.xlu0 %v1695_v43, %s1310_s11 }
  0xaa   :  { %1243 = vmatmul.mubr.msk.f32.vlgmr.msra.gmra.mxu0 %vm756_vm11, %v729_v53  ;;  %1277 = vmatmul.mubr.msk.f32.vlgmr.msra.gmra.mxu1 %vm756_vm11, %v729_v53  ;;  %v139_v52 = vsel %vm94_vm1, %v137_v39, %v138_v48 }
  0xab   :  { %v1708_v56 = vpop.permute.xlu1 %248  ;;  %v1710_v57 = vpop.permute.xlu0 %153 }
  0xad   :  { %576 = vrot.lane.b32.xlu1 %v224_v17, %s1315_s26  ;;  %524 = vrot.lane.b32.xlu0 %v130_v18, %s1314_s14  ;;  %v136_v17 = vsel %vm94_vm1, %v134_v8, %v135_v9 }
  0xaf   :  { %v455_v62 = vpop.permute.xlu1 %454  ;;  %v407_v1 = vpop.permute.xlu0 %406 }
  0xb0   :  { %v696_v60 = vsel %vm693_vm8, %v679_v46, %v455_v62  ;;  %v680_v61 = vsel %vm676_vm7, %v663_v21, %v407_v1  ;;  %v234_v62 = vrot.slane %v1785_v28, 2  ;;  %v235_v1 = vrot.slane %v55_v41, 2 }
  0xb1   :  { %368 = vrot.lane.b32.xlu1 %v133_v59, %s1311_s16  ;;  %167 = vrot.lane.b32.xlu0 %v133_v59, %s1309_s30 }
  0xb2   :  { %v236_v9 = vsel %vm191_vm0, %v234_v62, %v235_v1  ;;  %v60_v62 = vld [vmem:[%s2204_s0 + $0x130] sm:$0xff]  ;;  %v61_v1 = vld [vmem:[%s2204_s0 + $0x138] sm:$0x3] }
  0xb3   :  { %v1727_v10 = vpop.permute.xlu1 %298  ;;  %v1729_v11 = vpop.permute.xlu0 %250 }
  0xb5   :  { %578 = vrot.lane.b32.xlu1 %v227_v32, %s1315_s26  ;;  %420 = vrot.lane.b32.xlu0 %v227_v32, %s1312_s17 }
  0xb7   :  { %v511_v18 = vpop.permute.xlu1 %510  ;;  %v457_v19 = vpop.permute.xlu0 %456 }
  0xb8   :  { %v713_v13 = vsel %vm710_vm9, %v696_v60, %v511_v18  ;;  %v697_v15 = vsel %vm693_vm8, %v680_v61, %v457_v19  ;;  %v613_v19 = vsel %vm608_vm3, %v1449_v40, %v1683_v42 }
  0xb9   :  { %264 = vrot.lane.b32.xlu1 %v230_v12, %s1308_s29  ;;  %169 = vrot.lane.b32.xlu0 %v136_v17, %s1309_s30  ;;  %v630_v20 = vsel %vm625_vm4, %v613_v19, %v1708_v56  ;;  %v557_v19 = vrot.slane %v60_v62, 2 }
  0xba   :  { %v647_v25 = vsel %vm642_vm5, %v630_v20, %v1727_v10 }
  0xbb   :  { %v1745_v27 = vpop.permute.xlu1 %354  ;;  %v1747_v29 = vpop.permute.xlu0 %300 }
  0xbc   :  { %v664_v40 = vsel %vm659_vm6, %v647_v25, %v1745_v27  ;;  %v614_v27 = vsel %vm608_vm3, %v1470_v47, %v1710_v57 }
  0xbd   :  { %470 = vrot.lane.b32.xlu1 %v1695_v43, %s1313_s18  ;;  %422 = vrot.lane.b32.xlu0 %v230_v12, %s1312_s17 }
  0xbf   :  { %v565_v31 = vpop.permute.xlu1 %564  ;;  %v513_v32 = vpop.permute.xlu0 %512 }
  0xc0   :  { %v730_v33 = vsel %vm727_vm10, %v713_v13, %v565_v31  ;;  %v714_v38 = vsel %vm710_vm9, %v697_v15, %v513_v32  ;;  %v631_v31 = vsel %vm625_vm4, %v614_v27, %v1729_v11 }
  0xc1   :  { %314 = vrot.lane.b32.xlu1 %v1718_v3, %s1310_s11  ;;  %266 = vrot.lane.b32.xlu0 %v233_v30, %s1308_s29  ;;  %v648_v32 = vsel %vm642_vm5, %v631_v31, %v1747_v29  ;;  %v58_v29 = vld [vmem:[%s2204_s0 + $0x120] sm:$0xff] }
  0xc2   :  { %1245 = vmatprep.mubr.msk.f32.mxu0 %vm756_vm11, %v730_v33  ;;  %1279 = vmatprep.mubr.msk.f32.mxu1 %vm756_vm11, %v730_v33  ;;  %v343_v15 = vrot.slane %v58_v29, 1  ;;  %v397_v41 = vrot.slane %v58_v29, 2 }
  0xc3   :  { %v1771_v36 = vpop.permute.xlu1 %356  ;;  %v1773_v37 = vpop.permute.xlu0 %155 }
  0xc4   :  { %v665_v47 = vsel %vm659_vm6, %v648_v32, %v1771_v36  ;;  %v59_v36 = vld [vmem:[%s2204_s0 + $0x128] sm:$0x3] }
  0xc5   :  { %526 = vrot.lane.b32.xlu1 %v133_v59, %s1314_s14  ;;  %472 = vrot.lane.b32.xlu0 %v1718_v3, %s1313_s18  ;;  %v57_v59 = vld [vmem:[%s2204_s0 + $0x118] sm:$0x3]  ;;  %v398_v39 = vrot.slane %v59_v36, 2 }
  0xc6   :  { %v141_v5 = vrot.slane %v57_v59, 1  ;;  %v238_v23 = vrot.slane %v57_v59, 2 }
  0xc7   :  { %v567_v2 = vpop.permute.xlu1 %566  ;;  %v409_v44 = vpop.permute.xlu0 %408 }
  0xc8   :  { %v731_v45 = vsel %vm727_vm10, %v714_v38, %v567_v2  ;;  %v681_v42 = vsel %vm676_vm7, %v664_v40, %v409_v44  ;;  %v239_v46 = vsel %vm191_vm0, %v237_v22, %v238_v23  ;;  %v344_v38 = vrot.slane %v59_v36, 1 }
  0xc9   :  { %370 = vrot.lane.b32.xlu1 %v136_v17, %s1311_s16  ;;  %316 = vrot.lane.b32.xlu0 %v1785_v28, %s1310_s11  ;;  %v558_v22 = vrot.slane %v61_v1, 2 }
  0xca   :  { %1246 = vmatmul.mubr.msk.f32.gmra.mxu0 %vm756_vm11, %v731_v45  ;;  %1280 = vmatmul.mubr.msk.f32.gmra.mxu1 %vm756_vm11, %v731_v45  ;;  %v345_v45 = vsel %vm94_vm1, %v343_v15, %v344_v38 }
  0xcb   :  { %v1798_v49 = vpop.permute.xlu1 %252  ;;  %v1800_v50 = vpop.permute.xlu0 %157 }
  0xcd   :  { %580 = vrot.lane.b32.xlu1 %v230_v12, %s1315_s26  ;;  %528 = vrot.lane.b32.xlu0 %v136_v17, %s1314_s14  ;;  %v142_v12 = vsel %vm94_vm1, %v140_v4, %v141_v5  ;;  %v503_v4 = vrot.slane %v60_v62, 1  ;;  %v504_v5 = vrot.slane %v61_v1, 1 }
  0xcf   :  { %v459_v53 = vpop.permute.xlu1 %458  ;;  %v411_v54 = vpop.permute.xlu0 %410  ;;  %v505_v20 = vsel %vm94_vm1, %v503_v4, %v504_v5 }
  0xd0   :  { %v698_v56 = vsel %vm693_vm8, %v681_v42, %v459_v53  ;;  %v682_v57 = vsel %vm676_vm7, %v665_v47, %v411_v54  ;;  %v399_v53 = vsel %vm191_vm0, %v397_v41, %v398_v39 }
  0xd1   :  { %372 = vrot.lane.b32.xlu1 %v139_v52, %s1311_s16  ;;  %171 = vrot.lane.b32.xlu0 %v139_v52, %s1309_s30 }
  0xd3   :  { %v1817_v7 = vpop.permute.xlu1 %302  ;;  %v1819_v8 = vpop.permute.xlu0 %254 }
  0xd5   :  { %582 = vrot.lane.b32.xlu1 %v233_v30, %s1315_s26  ;;  %424 = vrot.lane.b32.xlu0 %v233_v30, %s1312_s17 }
  0xd7   :  { %v515_v17 = vpop.permute.xlu1 %514  ;;  %v461_v18 = vpop.permute.xlu0 %460 }
  0xd8   :  { %v715_v10 = vsel %vm710_vm9, %v698_v56, %v515_v17  ;;  %v699_v11 = vsel %vm693_vm8, %v682_v57, %v461_v18  ;;  %v615_v17 = vsel %vm608_vm3, %v1499_v58, %v1773_v37 }
  0xd9   :  { %268 = vrot.lane.b32.xlu1 %v236_v9, %s1308_s29  ;;  %173 = vrot.lane.b32.xlu0 %v142_v12, %s1309_s30  ;;  %v632_v18 = vsel %vm625_vm4, %v615_v17, %v1798_v49  ;;  %v559_v49 = vsel %vm191_vm0, %v557_v19, %v558_v22 }
  0xda   :  { %v649_v23 = vsel %vm642_vm5, %v632_v18, %v1817_v7 }
  0xdb   :  { %v1835_v26 = vpop.permute.xlu1 %358  ;;  %v1837_v16 = vpop.permute.xlu0 %304 }
  0xdc   :  { %v666_v42 = vsel %vm659_vm6, %v649_v23, %v1835_v26  ;;  %v616_v26 = vsel %vm608_vm3, %v1514_v63, %v1800_v50 }
  0xdd   :  { %474 = vrot.lane.b32.xlu1 %v1785_v28, %s1313_s18  ;;  %426 = vrot.lane.b32.xlu0 %v236_v9, %s1312_s17 }
  0xdf   :  { %v569_v60 = vpop.permute.xlu1 %568  ;;  %v517_v30 = vpop.permute.xlu0 %516 }
  0xe0   :  { %v732_v13 = vsel %vm727_vm10, %v715_v10, %v569_v60  ;;  %v716_v34 = vsel %vm710_vm9, %v699_v11, %v517_v30  ;;  %v633_v60 = vsel %vm625_vm4, %v616_v26, %v1819_v8 }
  0xe1   :  { %318 = vrot.lane.b32.xlu1 %v1808_v55, %s1310_s11  ;;  %270 = vrot.lane.b32.xlu0 %v239_v46, %s1308_s29  ;;  %v650_v30 = vsel %vm642_vm5, %v633_v60, %v1837_v16 }
  0xe2   :  { %1248 = vmatprep.mubr.msk.f32.mxu0 %vm756_vm11, %v732_v13  ;;  %1282 = vmatprep.mubr.msk.f32.mxu1 %vm756_vm11, %v732_v13 }
  0xe3   :  { %v1861_v33 = vpop.permute.xlu1 %360  ;;  %v1863_v0 = vpop.permute.xlu0 %159 }
  0xe4   :  { %v667_v31 = vsel %vm659_vm6, %v650_v30, %v1861_v33 }
  0xe5   :  { %530 = vrot.lane.b32.xlu1 %v139_v52, %s1314_s14  ;;  %476 = vrot.lane.b32.xlu0 %v1808_v55, %s1313_s18 }
  0xe7   :  { %v571_v35 = vpop.permute.xlu1 %570  ;;  %v413_v21 = vpop.permute.xlu0 %412 }
  0xe8   :  { %v733_v61 = vsel %vm727_vm10, %v716_v34, %v571_v35  ;;  %v683_v58 = vsel %vm676_vm7, %v666_v42, %v413_v21 }
  0xe9   :  { %374 = vrot.lane.b32.xlu1 %v142_v12, %s1311_s16  ;;  %320 = vrot.lane.b32.xlu0 %v58_v29, %s1310_s11 }
  0xea   :  { %1249 = vmatmul.mubr.msk.f32.gmra.mxu0 %vm756_vm11, %v733_v61  ;;  %1283 = vmatmul.mubr.msk.f32.gmra.mxu1 %vm756_vm11, %v733_v61  ;;  %v617_v61 = vsel %vm608_vm3, %v1549_v14, %v1863_v0 }
  0xeb   :  { %v1884_v2 = vpop.permute.xlu1 %256  ;;  %v1886_v44 = vpop.permute.xlu0 %161 }
  0xec   :  { %v634_v15 = vsel %vm625_vm4, %v617_v61, %v1884_v2  ;;  %v618_v14 = vsel %vm608_vm3, %v1564_v24, %v1886_v44 }
  0xed   :  { %584 = vrot.lane.b32.xlu1 %v236_v9, %s1315_s26  ;;  %532 = vrot.lane.b32.xlu0 %v142_v12, %s1314_s14 }
  0xef   :  { %v463_v48 = vpop.permute.xlu1 %462  ;;  %v415_v52 = vpop.permute.xlu0 %414 }
  0xf0   :  { %v700_v37 = vsel %vm693_vm8, %v683_v58, %v463_v48  ;;  %v684_v63 = vsel %vm676_vm7, %v667_v31, %v415_v52 }
  0xf1   :  { %428 = vrot.lane.b32.xlu1 %v239_v46, %s1312_s17  ;;  %376 = vrot.lane.b32.xlu0 %v345_v45, %s1311_s16 }
  0xf3   :  { %v307_v54 = vpop.permute.xlu1 %306  ;;  %v1894_v59 = vpop.permute.xlu0 %258 }
  0xf4   :  { %v651_v38 = vsel %vm642_vm5, %v634_v15, %v307_v54  ;;  %v635_v0 = vsel %vm625_vm4, %v618_v14, %v1894_v59 }
  0xf5   :  { %430 = vrot.lane.b32.xlu1 %v399_v53, %s1312_s17  ;;  %586 = vrot.lane.b32.xlu0 %v239_v46, %s1315_s26 }
  0xf7   :  { %v519_v9 = vpop.permute.xlu1 %518  ;;  %v465_v12 = vpop.permute.xlu0 %464 }
  0xf8   :  { %v717_v56 = vsel %vm710_vm9, %v700_v37, %v519_v9  ;;  %v701_v50 = vsel %vm693_vm8, %v684_v63, %v465_v12 }
  0xf9   :  { %480 = vrot.lane.b32.xlu1 %v60_v62, %s1313_s18  ;;  %478 = vrot.lane.b32.xlu0 %v58_v29, %s1313_s18 }
  0xfb   :  { %v363_v25 = vpop.permute.xlu1 %362  ;;  %v309_v40 = vpop.permute.xlu0 %308 }
  0xfc   :  { %v668_v39 = vsel %vm659_vm6, %v651_v38, %v363_v25  ;;  %v652_v2 = vsel %vm642_vm5, %v635_v0, %v309_v40 }
  0xfd   :  { %536 = vrot.lane.b32.xlu1 %v505_v20, %s1314_s14  ;;  %534 = vrot.lane.b32.xlu0 %v345_v45, %s1314_s14 }
  0xff   :  { %v573_v46 = vpop.permute.xlu1 %572  ;;  %v521_v10 = vpop.permute.xlu0 %520 }
 0x100   :  { %v734_v7 = vsel %vm727_vm10, %v717_v56, %v573_v46  ;;  %v718_v32 = vsel %vm710_vm9, %v701_v50, %v521_v10 }
 0x101   :  { %590 = vrot.lane.b32.xlu1 %v559_v49, %s1315_s26  ;;  %588 = vrot.lane.b32.xlu0 %v399_v53, %s1315_s26 }
 0x102   :  { %1251 = vmatprep.mubr.msk.f32.mxu0 %vm756_vm11, %v734_v7  ;;  %1285 = vmatprep.mubr.msk.f32.mxu1 %vm756_vm11, %v734_v7 }
 0x103   :  { %v365_v13 = vpop.permute.xlu1 %364  ;;  %v164_v27 = vpop.permute.xlu0 %163 }
 0x104   :  { %v669_v9 = vsel %vm659_vm6, %v652_v2, %v365_v13  ;;  %v619_v37 = vsel %vm608_vm3, %v1608_v51, %v164_v27 }
 0x107   :  { %v575_v47 = vpop.permute.xlu1 %574  ;;  %v417_v8 = vpop.permute.xlu0 %416 }
 0x108   :  { %v735_v57 = vsel %vm727_vm10, %v718_v32, %v575_v47  ;;  %v685_v48 = vsel %vm676_vm7, %v668_v39, %v417_v8 }
 0x109   :  { %1252 = vmatmul.mubr.msk.f32.gmra.mxu0 %vm756_vm11, %v735_v57  ;;  %1286 = vmatmul.mubr.msk.f32.gmra.mxu1 %vm756_vm11, %v735_v57 }
 0x10b   :  { %v261_v16 = vpop.permute.xlu1 %260  ;;  %v166_v11 = vpop.permute.xlu0 %165 }
 0x10c   :  { %v636_v49 = vsel %vm625_vm4, %v619_v37, %v261_v16  ;;  %v620_v51 = vsel %vm608_vm3, %v1630_v6, %v166_v11 }
 0x10f   :  { %v467_v29 = vpop.permute.xlu1 %466  ;;  %v419_v34 = vpop.permute.xlu0 %418 }
 0x110   :  { %v702_v52 = vsel %vm693_vm8, %v685_v48, %v467_v29  ;;  %v686_v12 = vsel %vm676_vm7, %v669_v9, %v419_v34 }
 0x113   :  { %v311_v35 = vpop.permute.xlu1 %310  ;;  %v263_v33 = vpop.permute.xlu0 %262 }
 0x114   :  { %v653_v56 = vsel %vm642_vm5, %v636_v49, %v311_v35  ;;  %v637_v27 = vsel %vm625_vm4, %v620_v51, %v263_v33 }
 0x117   :  { %v523_v21 = vpop.permute.xlu1 %522  ;;  %v469_v36 = vpop.permute.xlu0 %468 }
 0x118   :  { %v719_v53 = vsel %vm710_vm9, %v702_v52, %v523_v21  ;;  %v703_v17 = vsel %vm693_vm8, %v686_v12, %v469_v36 }
 0x11b   :  { %v367_v41 = vpop.permute.xlu1 %366  ;;  %v313_v45 = vpop.permute.xlu0 %312 }
 0x11c   :  { %v670_v7 = vsel %vm659_vm6, %v653_v56, %v367_v41  ;;  %v654_v50 = vsel %vm642_vm5, %v637_v27, %v313_v45 }
 0x11f   :  { %v577_v62 = vpop.permute.xlu1 %576  ;;  %v525_v1 = vpop.permute.xlu0 %524 }
 0x120   :  { %v736_v4 = vsel %vm727_vm10, %v719_v53, %v577_v62  ;;  %v720_v18 = vsel %vm710_vm9, %v703_v17, %v525_v1 }
 0x121   :  { %1254 = vmatprep.mubr.msk.f32.mxu0 %vm756_vm11, %v736_v4  ;;  %1288 = vmatprep.mubr.msk.f32.mxu1 %vm756_vm11, %v736_v4 }
 0x123   :  { %v369_v54 = vpop.permute.xlu1 %368  ;;  %v168_v5 = vpop.permute.xlu0 %167 }
 0x124   :  { %v671_v8 = vsel %vm659_vm6, %v654_v50, %v369_v54  ;;  %v621_v45 = vsel %vm608_vm3, %v1695_v43, %v168_v5 }
 0x127   :  { %v579_v24 = vpop.permute.xlu1 %578  ;;  %v421_v44 = vpop.permute.xlu0 %420 }
 0x128   :  { %v737_v19 = vsel %vm727_vm10, %v720_v18, %v579_v24  ;;  %v687_v26 = vsel %vm676_vm7, %v670_v7, %v421_v44 }
 0x129   :  { %1255 = vmatmul.mubr.msk.f32.gmra.mxu0 %vm756_vm11, %v737_v19  ;;  %1289 = vmatmul.mubr.msk.f32.gmra.mxu1 %vm756_vm11, %v737_v19 }
 0x12b   :  { %v265_v59 = vpop.permute.xlu1 %264  ;;  %v170_v20 = vpop.permute.xlu0 %169 }
 0x12c   :  { %v638_v39 = vsel %vm625_vm4, %v621_v45, %v265_v59  ;;  %v622_v43 = vsel %vm608_vm3, %v1718_v3, %v170_v20 }
 0x12f   :  { %v471_v22 = vpop.permute.xlu1 %470  ;;  %v423_v23 = vpop.permute.xlu0 %422 }
 0x130   :  { %v704_v60 = vsel %vm693_vm8, %v687_v26, %v471_v22  ;;  %v688_v57 = vsel %vm676_vm7, %v671_v8, %v423_v23  ;;  %v2013_v22 = vld [vmem:[%s2207_s3] ss:$0 sm:$0xff] }
 0x131   :  { %v2018_v23 = vld [vmem:[%s2208_s4] ss:$0 sm:$0xff] }
 0x133   :  { %v315_v25 = vpop.permute.xlu1 %314  ;;  %v267_v40 = vpop.permute.xlu0 %266 }
 0x134   :  { %v655_v48 = vsel %vm642_vm5, %v638_v39, %v315_v25  ;;  %v639_v5 = vsel %vm625_vm4, %v622_v43, %v267_v40 }
 0x137   :  { %v527_v42 = vpop.permute.xlu1 %526  ;;  %v473_v58 = vpop.permute.xlu0 %472 }
 0x138   :  { %v721_v30 = vsel %vm710_vm9, %v704_v60, %v527_v42  ;;  %v705_v16 = vsel %vm693_vm8, %v688_v57, %v473_v58 }
 0x13b   :  { %v371_v46 = vpop.permute.xlu1 %370  ;;  %v317_v10 = vpop.permute.xlu0 %316 }
 0x13c   :  { %v672_v62 = vsel %vm659_vm6, %v655_v48, %v371_v46  ;;  %v656_v9 = vsel %vm642_vm5, %v639_v5, %v317_v10 }
 0x13f   :  { %v581_v13 = vpop.permute.xlu1 %580  ;;  %v529_v31 = vpop.permute.xlu0 %528 }
 0x140   :  { %v738_v63 = vsel %vm727_vm10, %v721_v30, %v581_v13  ;;  %v722_v29 = vsel %vm710_vm9, %v705_v16, %v529_v31 }
 0x141   :  { %1257 = vmatprep.mubr.msk.f32.mxu0 %vm756_vm11, %v738_v63  ;;  %1291 = vmatprep.mubr.msk.f32.mxu1 %vm756_vm11, %v738_v63 }
 0x143   :  { %v373_v32 = vpop.permute.xlu1 %372  ;;  %v172_v47 = vpop.permute.xlu0 %171 }
 0x144   :  { %v673_v18 = vsel %vm659_vm6, %v656_v9, %v373_v32  ;;  %v623_v10 = vsel %vm608_vm3, %v1785_v28, %v172_v47 }
 0x147   :  { %v583_v34 = vpop.permute.xlu1 %582  ;;  %v425_v6 = vpop.permute.xlu0 %424 }
 0x148   :  { %v739_v11 = vsel %vm727_vm10, %v722_v29, %v583_v34  ;;  %v689_v1 = vsel %vm676_vm7, %v672_v62, %v425_v6 }
 0x149   :  { %1258 = vmatmul.mubr.msk.f32.gmra.mxu0 %vm756_vm11, %v739_v11  ;;  %1292 = vmatmul.mubr.msk.f32.gmra.mxu1 %vm756_vm11, %v739_v11 }
 0x14b   :  { %v269_v35 = vpop.permute.xlu1 %268  ;;  %v174_v33 = vpop.permute.xlu0 %173 }
 0x14c   :  { %v624_v7 = vsel %vm608_vm3, %v1808_v55, %v174_v33  ;;  %v640_v30 = vsel %vm625_vm4, %v623_v10, %v269_v35 }
 0x14f   :  { %v475_v21 = vpop.permute.xlu1 %474  ;;  %v427_v36 = vpop.permute.xlu0 %426 }
 0x150   :  { %v706_v4 = vsel %vm693_vm8, %v689_v1, %v475_v21  ;;  %v690_v24 = vsel %vm676_vm7, %v673_v18, %v427_v36 }
 0x153   :  { %v319_v61 = vpop.permute.xlu1 %318  ;;  %v271_v15 = vpop.permute.xlu0 %270 }
 0x154   :  { %v641_v28 = vsel %vm625_vm4, %v624_v7, %v271_v15  ;;  %v657_v55 = vsel %vm642_vm5, %v640_v30, %v319_v61 }
 0x157   :  { %v531_v38 = vpop.permute.xlu1 %530  ;;  %v477_v41 = vpop.permute.xlu0 %476 }
 0x158   :  { %v723_v14 = vsel %vm710_vm9, %v706_v4, %v531_v38  ;;  %v707_v44 = vsel %vm693_vm8, %v690_v24, %v477_v41 }
 0x15b   :  { %v375_v52 = vpop.permute.xlu1 %374  ;;  %v321_v53 = vpop.permute.xlu0 %320 }
 0x15c   :  { %v658_v13 = vsel %vm642_vm5, %v641_v28, %v321_v53  ;;  %v674_v51 = vsel %vm659_vm6, %v657_v55, %v375_v52 }
 0x15f   :  { %v585_v0 = vpop.permute.xlu1 %584  ;;  %v533_v2 = vpop.permute.xlu0 %532 }
 0x160   :  { %v740_v54 = vsel %vm727_vm10, %v723_v14, %v585_v0  ;;  %v724_v19 = vsel %vm710_vm9, %v707_v44, %v533_v2 }
 0x161   :  { %1260 = vmatprep.mubr.msk.f32.mxu0 %vm756_vm11, %v740_v54  ;;  %1294 = vmatprep.mubr.msk.f32.mxu1 %vm756_vm11, %v740_v54 }
 0x163   :  { %v429_v12 = vpop.permute.xlu1 %428  ;;  %v377_v17 = vpop.permute.xlu0 %376 }
 0x164   :  { %v675_v27 = vsel %vm659_vm6, %v658_v13, %v377_v17  ;;  %v691_v50 = vsel %vm676_vm7, %v674_v51, %v429_v12 }
 0x167   :  { %v431_v59 = vpop.permute.xlu1 %430  ;;  %v587_v3 = vpop.permute.xlu0 %586 }
 0x168   :  { %v741_v20 = vsel %vm727_vm10, %v724_v19, %v587_v3  ;;  %v692_v32 = vsel %vm676_vm7, %v675_v27, %v431_v59 }
 0x169   :  { %1261 = vmatmul.mubr.msk.f32.gmra.mxu0 %vm756_vm11, %v741_v20  ;;  %1295 = vmatmul.mubr.msk.f32.gmra.mxu1 %vm756_vm11, %v741_v20 }
 0x16a   :  { %v1244_v25 = vpop.f32.mrf.mxu0  ;;  %v1278_v40 = vpop.f32.mrf.mxu1 }
 0x16b   :  { %v881_v42 = vadd.f32 %v1244_v25, %v2013_v22  ;;  %v1041_v58 = vadd.f32 %v1278_v40, %v2018_v23  ;;  %v481_v37 = vpop.permute.xlu1 %480  ;;  %v479_v49 = vpop.permute.xlu0 %478 }
 0x16c   :  { %v875_v56 = vpop.f32.mrf.mxu0  ;;  %v1035_v46 = vpop.f32.mrf.mxu1  ;;  %v709_v47 = vsel %vm693_vm8, %v692_v32, %v481_v37  ;;  %v708_v8 = vsel %vm693_vm8, %v691_v50, %v479_v49 }
 0x16d   :  { %1115 = vst.msk [vmem:[%s2209_s5 + $0x8] sm:$0xff] %vm625_vm4, %v881_v42  ;;  %1131 = vst.msk [vmem:[%s2210_s6 + $0x8] sm:$0xff] %vm625_vm4, %v1041_v58  ;;  %v876_v26 = vadd.f32 %v2013_v22, %v875_v56  ;;  %v1036_v60 = vadd.f32 %v2018_v23, %v1035_v46 }
 0x16f   :  { %1114 = vst.msk [vmem:[%s2209_s5] sm:$0xff] %vm625_vm4, %v876_v26  ;;  %1130 = vst.msk [vmem:[%s2210_s6] sm:$0xff] %vm625_vm4, %v1036_v60  ;;  %v537_v31 = vpop.permute.xlu1 %536  ;;  %v535_v63 = vpop.permute.xlu0 %534 }
 0x170   :  { %v726_v57 = vsel %vm710_vm9, %v709_v47, %v537_v31  ;;  %v725_v16 = vsel %vm710_vm9, %v708_v8, %v535_v63 }
 0x173   :  { %v591_v29 = vpop.permute.xlu1 %590  ;;  %v589_v34 = vpop.permute.xlu0 %588 }
 0x174   :  { %v743_v6 = vsel %vm727_vm10, %v726_v57, %v591_v29  ;;  %v742_v11 = vsel %vm727_vm10, %v725_v16, %v589_v34 }
 0x175   :  { %1263 = vmatprep.mubr.msk.f32.mxu0 %vm756_vm11, %v742_v11  ;;  %1297 = vmatprep.mubr.msk.f32.mxu1 %vm756_vm11, %v742_v11 }
 0x176   :  { %1264 = vmatmul.mubr.msk.f32.gmra.mxu0 %vm756_vm11, %v743_v6  ;;  %1298 = vmatmul.mubr.msk.f32.gmra.mxu1 %vm756_vm11, %v743_v6 }
 0x18a   :  { %v1247_v35 = vpop.f32.mrf.mxu0  ;;  %v1281_v33 = vpop.f32.mrf.mxu1 }
 0x18b   :  { %v891_v21 = vadd.f32 %v1247_v35, %v2013_v22  ;;  %v1051_v36 = vadd.f32 %v1281_v33, %v2018_v23 }
 0x18c   :  { %v885_v61 = vpop.f32.mrf.mxu0  ;;  %v1045_v15 = vpop.f32.mrf.mxu1 }
 0x18d   :  { %1117 = vst.msk [vmem:[%s2209_s5 + $0x18] sm:$0xff] %vm625_vm4, %v891_v21  ;;  %1133 = vst.msk [vmem:[%s2210_s6 + $0x18] sm:$0xff] %vm625_vm4, %v1051_v36  ;;  %v886_v38 = vadd.f32 %v2013_v22, %v885_v61  ;;  %v1046_v41 = vadd.f32 %v2018_v23, %v1045_v15 }
 0x18f   :  { %1116 = vst.msk [vmem:[%s2209_s5 + $0x10] sm:$0xff] %vm625_vm4, %v886_v38  ;;  %1132 = vst.msk [vmem:[%s2210_s6 + $0x10] sm:$0xff] %vm625_vm4, %v1046_v41 }
 0x1aa   :  { %v1250_v45 = vpop.f32.mrf.mxu0  ;;  %v1284_v39 = vpop.f32.mrf.mxu1 }
 0x1ab   :  { %v901_v48 = vadd.f32 %v1250_v45, %v2013_v22  ;;  %v1061_v52 = vadd.f32 %v1284_v39, %v2018_v23 }
 0x1ac   :  { %v895_v53 = vpop.f32.mrf.mxu0  ;;  %v1055_v62 = vpop.f32.mrf.mxu1 }
 0x1ad   :  { %1119 = vst.msk [vmem:[%s2209_s5 + $0x28] sm:$0xff] %vm625_vm4, %v901_v48  ;;  %1135 = vst.msk [vmem:[%s2210_s6 + $0x28] sm:$0xff] %vm625_vm4, %v1061_v52  ;;  %v896_v1 = vadd.f32 %v2013_v22, %v895_v53  ;;  %v1056_v4 = vadd.f32 %v2018_v23, %v1055_v62 }
 0x1af   :  { %1118 = vst.msk [vmem:[%s2209_s5 + $0x20] sm:$0xff] %vm625_vm4, %v896_v1  ;;  %1134 = vst.msk [vmem:[%s2210_s6 + $0x20] sm:$0xff] %vm625_vm4, %v1056_v4 }
 0x1c9   :  { %v1253_v14 = vpop.f32.mrf.mxu0  ;;  %v1287_v0 = vpop.f32.mrf.mxu1 }
 0x1ca   :  { %v911_v2 = vadd.f32 %v1253_v14, %v2013_v22  ;;  %v1071_v54 = vadd.f32 %v1287_v0, %v2018_v23 }
 0x1cb   :  { %v905_v43 = vpop.f32.mrf.mxu0  ;;  %v1065_v5 = vpop.f32.mrf.mxu1 }
 0x1cc   :  { %1121 = vst.msk [vmem:[%s2209_s5 + $0x38] sm:$0xff] %vm625_vm4, %v911_v2  ;;  %1137 = vst.msk [vmem:[%s2210_s6 + $0x38] sm:$0xff] %vm625_vm4, %v1071_v54  ;;  %v906_v9 = vadd.f32 %v2013_v22, %v905_v43  ;;  %v1066_v12 = vadd.f32 %v2018_v23, %v1065_v5 }
 0x1ce   :  { %1120 = vst.msk [vmem:[%s2209_s5 + $0x30] sm:$0xff] %vm625_vm4, %v906_v9  ;;  %1136 = vst.msk [vmem:[%s2210_s6 + $0x30] sm:$0xff] %vm625_vm4, %v1066_v12 }
 0x1e9   :  { %v1256_v17 = vpop.f32.mrf.mxu0  ;;  %v1290_v18 = vpop.f32.mrf.mxu1 }
 0x1ea   :  { %v921_v24 = vadd.f32 %v1256_v17, %v2013_v22  ;;  %v1081_v44 = vadd.f32 %v1290_v18, %v2018_v23 }
 0x1eb   :  { %v915_v19 = vpop.f32.mrf.mxu0  ;;  %v1075_v59 = vpop.f32.mrf.mxu1 }
 0x1ec   :  { %1123 = vst.msk [vmem:[%s2209_s5 + $0x48] sm:$0xff] %vm625_vm4, %v921_v24  ;;  %1139 = vst.msk [vmem:[%s2210_s6 + $0x48] sm:$0xff] %vm625_vm4, %v1081_v44  ;;  %v916_v3 = vadd.f32 %v2013_v22, %v915_v19  ;;  %v1076_v20 = vadd.f32 %v2018_v23, %v1075_v59 }
 0x1ee   :  { %1122 = vst.msk [vmem:[%s2209_s5 + $0x40] sm:$0xff] %vm625_vm4, %v916_v3  ;;  %1138 = vst.msk [vmem:[%s2210_s6 + $0x40] sm:$0xff] %vm625_vm4, %v1076_v20 }
 0x209   :  { %v1259_v25 = vpop.f32.mrf.mxu0  ;;  %v1293_v40 = vpop.f32.mrf.mxu1 }
 0x20a   :  { %v931_v42 = vadd.f32 %v1259_v25, %v2013_v22  ;;  %v1091_v58 = vadd.f32 %v1293_v40, %v2018_v23 }
 0x20b   :  { %v925_v37 = vpop.f32.mrf.mxu0  ;;  %v1085_v49 = vpop.f32.mrf.mxu1 }
 0x20c   :  { %1125 = vst.msk [vmem:[%s2209_s5 + $0x58] sm:$0xff] %vm625_vm4, %v931_v42  ;;  %1141 = vst.msk [vmem:[%s2210_s6 + $0x58] sm:$0xff] %vm625_vm4, %v1091_v58  ;;  %v926_v56 = vadd.f32 %v2013_v22, %v925_v37  ;;  %v1086_v46 = vadd.f32 %v2018_v23, %v1085_v49 }
 0x20e   :  { %1124 = vst.msk [vmem:[%s2209_s5 + $0x50] sm:$0xff] %vm625_vm4, %v926_v56  ;;  %1140 = vst.msk [vmem:[%s2210_s6 + $0x50] sm:$0xff] %vm625_vm4, %v1086_v46 }
 0x229   :  { %v1262_v10 = vpop.f32.mrf.mxu0  ;;  %v1296_v7 = vpop.f32.mrf.mxu1 }
 0x22a   :  { %v941_v26 = vadd.f32 %v1262_v10, %v2013_v22  ;;  %v1101_v60 = vadd.f32 %v1296_v7, %v2018_v23 }
 0x22b   :  { %v935_v30 = vpop.f32.mrf.mxu0  ;;  %v1095_v28 = vpop.f32.mrf.mxu1 }
 0x22c   :  { %1127 = vst.msk [vmem:[%s2209_s5 + $0x68] sm:$0xff] %vm625_vm4, %v941_v26  ;;  %1143 = vst.msk [vmem:[%s2210_s6 + $0x68] sm:$0xff] %vm625_vm4, %v1101_v60  ;;  %v936_v55 = vadd.f32 %v2013_v22, %v935_v30  ;;  %v1096_v13 = vadd.f32 %v2018_v23, %v1095_v28 }
 0x22e   :  { %1126 = vst.msk [vmem:[%s2209_s5 + $0x60] sm:$0xff] %vm625_vm4, %v936_v55  ;;  %1142 = vst.msk [vmem:[%s2210_s6 + $0x60] sm:$0xff] %vm625_vm4, %v1096_v13 }
 0x236   :  { %v1265_v31 = vpop.f32.mrf.mxu0  ;;  %v1299_v63 = vpop.f32.mrf.mxu1 }
 0x237   :  { %v951_v51 = vadd.f32 %v1265_v31, %v2013_v22  ;;  %v1111_v27 = vadd.f32 %v1299_v63, %v2018_v23 }
 0x238   :  { %v945_v50 = vpop.f32.mrf.mxu0  ;;  %v1105_v32 = vpop.f32.mrf.mxu1 }
 0x239   :  { %1129 = vst.msk [vmem:[%s2209_s5 + $0x78] sm:$0xff] %vm625_vm4, %v951_v51  ;;  %1145 = vst.msk [vmem:[%s2210_s6 + $0x78] sm:$0xff] %vm625_vm4, %v1111_v27  ;;  %v946_v47 = vadd.f32 %v2013_v22, %v945_v50  ;;  %v1106_v8 = vadd.f32 %v2018_v23, %v1105_v32 }
 0x23b   :  { %1128 = vst.msk [vmem:[%s2209_s5 + $0x70] sm:$0xff] %vm625_vm4, %v946_v47  ;;  %1144 = vst.msk [vmem:[%s2210_s6 + $0x70] sm:$0xff] %vm625_vm4, %v1106_v8 }

</bundles_post_ra>
